<compile_context>
chip_gen: v5e
topology: v5e:2x2
jax: 0.10.0
libtpu: 0.0.40
codegen_flags: <defaults>
</compile_context>

<pallas_src>
import math

import jax
import jax.numpy as jnp
from jax import lax
from jax.experimental import pallas as pl
from jax.experimental.pallas import tpu as pltpu


def _round_up(x, m):
    return (x + m - 1) // m * m


def _make_kernel(C, alpha, gamma, hw_tile, hw_actual, mask_needed):
    # Static softplus LUT: z in {0..C-1}; softplus(-z) = log1p(exp(-z)).
    sp_table = [math.log1p(math.exp(-c)) for c in range(C)]

    def kernel(x_ref, t_ref, out_ref):
        # x_ref  : (N_TILE, C, S_TILE, 128) input dtype
        # t_ref  : (N_TILE, S_TILE, 128)    target dtype
        # out_ref: (1, 1, 128) f32 per-block per-lane partial sums
        t = t_ref[...].astype(jnp.float32)

        # argmax over channel axis, first occurrence on ties (== torch.argmax);
        # pure VPU compare/select, unrolled over the (small) channel count.
        best = x_ref[:, 0, :, :].astype(jnp.float32)
        z = jnp.zeros(best.shape, jnp.float32)
        for c in range(1, C):
            xc = x_ref[:, c, :, :].astype(jnp.float32)
            better = xc > best
            best = jnp.where(better, xc, best)
            z = jnp.where(better, jnp.float32(c), z)

        # softplus(-z) via static LUT selects (no per-element log/exp here).
        sp = jnp.full(z.shape, jnp.float32(sp_table[0]), jnp.float32)
        for c in range(1, C):
            sp = jnp.where(z == jnp.float32(c), jnp.float32(sp_table[c]), sp)

        # BCE-with-logits; z >= 0 so max(z,0)=z and |z|=z:
        #   bce = z - z*t + log1p(exp(-z)) = z*(1-t) + sp
        bce = z * (1.0 - t) + sp
        pt = jnp.exp(-bce)                       # the only transcendental left
        omp = 1.0 - pt
        if gamma == 2.0:
            fw = omp * omp
        else:
            fw = jnp.power(omp, jnp.float32(gamma))
        f_loss = jnp.float32(alpha) * fw * bce   # (N_TILE, S_TILE, 128)

        if mask_needed:
            # zero out the zero-padded tail of the HW axis
            s_tile = f_loss.shape[1]
            s_idx = lax.broadcasted_iota(jnp.int32, (s_tile, 128), 0)
            l_idx = lax.broadcasted_iota(jnp.int32, (s_tile, 128), 1)
            hw_idx = pl.program_id(1) * hw_tile + s_idx * 128 + l_idx
            valid = (hw_idx < hw_actual)[None, :, :]
            f_loss = jnp.where(valid, f_loss, 0.0)

        # Lane-dense partial sums; final cross-lane reduce + mean done outside.
        out_ref[...] = jnp.sum(f_loss, axis=(0, 1))[None, None, :]

    return kernel


def focal_loss_vgg(inputs, targets, alpha=0.25, gamma=2,
                   max_block_bytes=3 * 1024 * 1024):
    """Forward of FocalLoss_VGG (logits=True, weight=None, reduce=True).

    inputs:  (N, C, H, W) float
    targets: (N, H, W)    float in [0, 1]
    """
    # TODO(synk): reduce=False (per-element F_loss) and logits=False (CE)
    # branches of the original module are not implemented here.
    N, C, H, W = inputs.shape
    assert targets.shape == (N, H, W)
    HW = H * W

    x = inputs.reshape(N, C, HW)
    t = targets.reshape(N, HW)

    # ---- choose tiles: big lane-dense blocks, sized against VMEM budget ----
    bpp = C * x.dtype.itemsize + t.dtype.itemsize     # bytes/pixel per block set
    hw128 = _round_up(HW, 128)
    if hw128 * bpp <= max_block_bytes:
        hw_tile = hw128
        n_tile = max(1, min(N, max_block_bytes // (hw128 * bpp)))
        while N % n_tile != 0:                        # grid needs a divisor of N
            n_tile -= 1
    else:
        n_tile = 1
        # multiple of 8*128 so block sublane dim respects the (8,128) tiling
        hw_tile = max(1024, (max_block_bytes // bpp) // 1024 * 1024)
    hw_pad = _round_up(HW, hw_tile)

    if hw_pad != HW:
        x = jnp.pad(x, ((0, 0), (0, 0), (0, hw_pad - HW)))
        t = jnp.pad(t, ((0, 0), (0, hw_pad - HW)))

    s_full = hw_pad // 128
    s_tile = hw_tile // 128
    x = x.reshape(N, C, s_full, 128)   # pure reshapes, no HBM pass
    t = t.reshape(N, s_full, 128)

    grid = (N // n_tile, hw_pad // hw_tile)
    kernel = _make_kernel(C, float(alpha), float(gamma),
                          hw_tile, HW, hw_pad != HW)

    partials = pl.pallas_call(
        kernel,
        out_shape=jax.ShapeDtypeStruct((grid[0], grid[1], 128), jnp.float32),
        grid_spec=pltpu.PrefetchScalarGridSpec(
            num_scalar_prefetch=0,
            grid=grid,
            in_specs=[
                pl.BlockSpec((n_tile, C, s_tile, 128), lambda i, j: (i, 0, j, 0)),
                pl.BlockSpec((n_tile, s_tile, 128), lambda i, j: (i, j, 0)),
            ],
            out_specs=pl.BlockSpec((1, 1, 128), lambda i, j: (i, j, 0)),
        ),
        compiler_params=pltpu.CompilerParams(
            dimension_semantics=("parallel", "parallel"),
            vmem_limit_bytes=48 * 1024 * 1024,
        ),
    )(x, t)

    # tiny final reduction + mean (divide by the true, un-padded element count)
    return jnp.sum(partials) / jnp.float32(N * HW)


def focal_loss_vgg_ref(inputs, targets, alpha=0.25, gamma=2):
    """Plain-JAX reference of the PyTorch forward."""
    z = jnp.argmax(inputs, axis=1).astype(jnp.float32)
    bce = jnp.maximum(z, 0.0) - z * targets + jnp.log1p(jnp.exp(-jnp.abs(z)))
    pt = jnp.exp(-bce)
    return jnp.mean(alpha * (1.0 - pt) ** gamma * bce)


if __name__ == "__main__":
    key = jax.random.PRNGKey(0)
    k1, k2 = jax.random.split(key)
    # Small shapes consistent with the module: N=2, C=4, H=W=16
    inputs = jax.random.normal(k1, (2, 4, 16, 16), dtype=jnp.float32)
    targets = jax.random.uniform(k2, (2, 16, 16), dtype=jnp.float32)

    loss = focal_loss_vgg(inputs, targets)
    loss = jax.block_until_ready(loss)

    ref = focal_loss_vgg_ref(inputs, targets)
    assert jnp.allclose(loss, ref, atol=1e-5, rtol=1e-5), (loss, ref)

    print("KERNEL_OK")
</pallas_src>

<mosaic_0001>
module attributes {stable_mosaic.version = 11 : i64} {
  func.func @kernel(%arg0: i32, %arg1: i32, %arg2: memref<2x4x2x128xf32, #tpu.memory_space<vmem>>, %arg3: memref<2x2x128xf32, #tpu.memory_space<vmem>>, %arg4: memref<1x1x128xf32, #tpu.memory_space<vmem>>) attributes {dimension_semantics = [#tpu.dimension_semantics<parallel>, #tpu.dimension_semantics<parallel>], iteration_bounds = array<i64: 1, 1>, scalar_prefetch = 0 : i64, scratch_operands = 0 : i64, tpu.core_type = #tpu.core_type<tc>, window_params = [{transform_indices = @transform_0, window_bounds = array<i64: 2, 4, 2, 128>}, {transform_indices = @transform_1, window_bounds = array<i64: 2, 2, 128>}, {transform_indices = @transform_2, window_bounds = array<i64: 1, 1, 128>}]} {
    %c0 = arith.constant 0 : index
    %c0_0 = arith.constant 0 : index
    %c0_1 = arith.constant 0 : index
    %0 = vector.load %arg3[%c0, %c0_0, %c0_1] : memref<2x2x128xf32, #tpu.memory_space<vmem>>, vector<2x2x128xf32>
    %c0_2 = arith.constant 0 : index
    %c0_3 = arith.constant 0 : index
    %c0_4 = arith.constant 0 : index
    %c0_5 = arith.constant 0 : index
    %1 = vector.load %arg2[%c0_2, %c0_3, %c0_4, %c0_5] : memref<2x4x2x128xf32, #tpu.memory_space<vmem>>, vector<2x1x2x128xf32>
    %2 = vector.shape_cast %1 : vector<2x1x2x128xf32> to vector<2x2x128xf32>
    %cst = arith.constant 0.000000e+00 : f32
    %3 = vector.broadcast %cst : f32 to vector<2x2x128xf32>
    %c0_6 = arith.constant 0 : index
    %c1 = arith.constant 1 : index
    %c0_7 = arith.constant 0 : index
    %c0_8 = arith.constant 0 : index
    %4 = vector.load %arg2[%c0_6, %c1, %c0_7, %c0_8] : memref<2x4x2x128xf32, #tpu.memory_space<vmem>>, vector<2x1x2x128xf32>
    %5 = vector.shape_cast %4 : vector<2x1x2x128xf32> to vector<2x2x128xf32>
    %6 = arith.cmpf ogt, %5, %2 : vector<2x2x128xf32>
    %7 = arith.select %6, %5, %2 : vector<2x2x128xi1>, vector<2x2x128xf32>
    %cst_9 = arith.constant 1.000000e+00 : f32
    %8 = vector.broadcast %cst_9 : f32 to vector<2x2x128xf32>
    %9 = arith.select %6, %8, %3 : vector<2x2x128xi1>, vector<2x2x128xf32>
    %c0_10 = arith.constant 0 : index
    %c2 = arith.constant 2 : index
    %c0_11 = arith.constant 0 : index
    %c0_12 = arith.constant 0 : index
    %10 = vector.load %arg2[%c0_10, %c2, %c0_11, %c0_12] : memref<2x4x2x128xf32, #tpu.memory_space<vmem>>, vector<2x1x2x128xf32>
    %11 = vector.shape_cast %10 : vector<2x1x2x128xf32> to vector<2x2x128xf32>
    %12 = arith.cmpf ogt, %11, %7 : vector<2x2x128xf32>
    %13 = arith.select %12, %11, %7 : vector<2x2x128xi1>, vector<2x2x128xf32>
    %cst_13 = arith.constant 2.000000e+00 : f32
    %14 = vector.broadcast %cst_13 : f32 to vector<2x2x128xf32>
    %15 = arith.select %12, %14, %9 : vector<2x2x128xi1>, vector<2x2x128xf32>
    %c0_14 = arith.constant 0 : index
    %c3 = arith.constant 3 : index
    %c0_15 = arith.constant 0 : index
    %c0_16 = arith.constant 0 : index
    %16 = vector.load %arg2[%c0_14, %c3, %c0_15, %c0_16] : memref<2x4x2x128xf32, #tpu.memory_space<vmem>>, vector<2x1x2x128xf32>
    %17 = vector.shape_cast %16 : vector<2x1x2x128xf32> to vector<2x2x128xf32>
    %18 = arith.cmpf ogt, %17, %13 : vector<2x2x128xf32>
    %cst_17 = arith.constant 3.000000e+00 : f32
    %19 = vector.broadcast %cst_17 : f32 to vector<2x2x128xf32>
    %20 = arith.select %18, %19, %15 : vector<2x2x128xi1>, vector<2x2x128xf32>
    %cst_18 = arith.constant 0.693147182 : f32
    %21 = vector.broadcast %cst_18 : f32 to vector<2x2x128xf32>
    %cst_19 = arith.constant 1.000000e+00 : f32
    %22 = vector.broadcast %cst_19 : f32 to vector<2x2x128xf32>
    %23 = arith.cmpf oeq, %20, %22 : vector<2x2x128xf32>
    %cst_20 = arith.constant 0.313261688 : f32
    %24 = vector.broadcast %cst_20 : f32 to vector<2x2x128xf32>
    %25 = arith.select %23, %24, %21 : vector<2x2x128xi1>, vector<2x2x128xf32>
    %cst_21 = arith.constant 2.000000e+00 : f32
    %26 = vector.broadcast %cst_21 : f32 to vector<2x2x128xf32>
    %27 = arith.cmpf oeq, %20, %26 : vector<2x2x128xf32>
    %cst_22 = arith.constant 0.126928017 : f32
    %28 = vector.broadcast %cst_22 : f32 to vector<2x2x128xf32>
    %29 = arith.select %27, %28, %25 : vector<2x2x128xi1>, vector<2x2x128xf32>
    %cst_23 = arith.constant 3.000000e+00 : f32
    %30 = vector.broadcast %cst_23 : f32 to vector<2x2x128xf32>
    %31 = arith.cmpf oeq, %20, %30 : vector<2x2x128xf32>
    %cst_24 = arith.constant 0.048587352 : f32
    %32 = vector.broadcast %cst_24 : f32 to vector<2x2x128xf32>
    %33 = arith.select %31, %32, %29 : vector<2x2x128xi1>, vector<2x2x128xf32>
    %cst_25 = arith.constant 1.000000e+00 : f32
    %34 = vector.broadcast %cst_25 : f32 to vector<2x2x128xf32>
    %35 = arith.subf %34, %0 : vector<2x2x128xf32>
    %36 = arith.mulf %20, %35 : vector<2x2x128xf32>
    %37 = arith.addf %36, %33 : vector<2x2x128xf32>
    %cst_26 = arith.constant 0.000000e+00 : f32
    %38 = vector.broadcast %cst_26 : f32 to vector<2x2x128xf32>
    %39 = arith.subf %38, %37 : vector<2x2x128xf32>
    %40 = math.exp %39 : vector<2x2x128xf32>
    %cst_27 = arith.constant 1.000000e+00 : f32
    %41 = vector.broadcast %cst_27 : f32 to vector<2x2x128xf32>
    %42 = arith.subf %41, %40 : vector<2x2x128xf32>
    %43 = arith.mulf %42, %42 : vector<2x2x128xf32>
    %cst_28 = arith.constant 2.500000e-01 : f32
    %44 = vector.broadcast %cst_28 : f32 to vector<2x2x128xf32>
    %45 = arith.mulf %44, %43 : vector<2x2x128xf32>
    %46 = arith.mulf %45, %37 : vector<2x2x128xf32>
    %cst_29 = arith.constant dense<0.000000e+00> : vector<128xf32>
    %47 = vector.multi_reduction <add>, %46, %cst_29 [0, 1] : vector<2x2x128xf32> to vector<128xf32>
    %48 = vector.shape_cast %47 : vector<128xf32> to vector<1x1x128xf32>
    %c0_30 = arith.constant 0 : index
    %c0_31 = arith.constant 0 : index
    %c0_32 = arith.constant 0 : index
    %49 = vector.load %arg4[%c0_30, %c0_31, %c0_32] : memref<1x1x128xf32, #tpu.memory_space<vmem>>, vector<1x1x128xf32>
    tpu.vector_store %arg4[%c0_30, %c0_31, %c0_32], %48 {strides = array<i32>} : memref<1x1x128xf32, #tpu.memory_space<vmem>>, vector<1x1x128xf32>,
    return
  }
  func.func @transform_0(%arg0: i32, %arg1: i32) -> (i32, i32, i32, i32) {
    %c0_i32 = arith.constant 0 : i32
    %c0_i32_0 = arith.constant 0 : i32
    %c0_i32_1 = arith.constant 0 : i32
    return %arg0, %c0_i32, %arg1, %c0_i32_0 : i32, i32, i32, i32
  }
  func.func @transform_1(%arg0: i32, %arg1: i32) -> (i32, i32, i32) {
    %c0_i32 = arith.constant 0 : i32
    %c0_i32_0 = arith.constant 0 : i32
    return %arg0, %arg1, %c0_i32 : i32, i32, i32
  }
  func.func @transform_2(%arg0: i32, %arg1: i32) -> (i32, i32, i32) {
    %c0_i32 = arith.constant 0 : i32
    %c0_i32_0 = arith.constant 0 : i32
    return %arg0, %arg1, %c0_i32 : i32, i32, i32
  }
}

</mosaic_0001>

<bundles_post_ra>
// kernel: tpu_custom_call.1
= control target key start
LH: loop header
LB: loop body
LE: loop exit
PB: predicated region body
PF: predicated region fallthrough
CT: control target
= control target key end

     0   :  { %7 = vsyncpa [#allocation3], 0  ;;  %s254_s0 = inlined_call_operand.hbm [shape: f32[2,4,2,128], index: 0, kind: input, shape index: {}]   ;;  %s255_s1 = inlined_call_operand.hbm [shape: f32[2,2,128], index: 1, kind: input, shape index: {}]   ;;  %s256_s2 = inlined_call_operand.hbm [shape: f32[1,1,128], index: 2, kind: output, shape index: {}]  }
   0x1   :  { %8 = vsyncpa [#allocation6], 0 }
   0x2   :  { %9 = vsyncpa [#allocation4], 0  ;;  %s14_s11 = sshll.u32 %s254_s0, 4  ;;  %s223_s12 = smov [#allocation2]   ;;  %s15_s11 = int_to_ptr.hbm [resolvable:$true] %s14_s11 }
   0x3   :  { %s16_s13 = sshll.u32 %s223_s12, 4  ;;  %s27_s16 = sshll.u32 %s255_s1, 4  ;;  %s17_s13 = int_to_ptr.vmem [resolvable:$true] %s16_s13  ;;  %s28_s16 = int_to_ptr.hbm [resolvable:$true] %s27_s16 }
   0x4   :  { %s224_s17 = smov 32   ;;  %s225_s18 = smov 2  }
   0x5   :  { %22 = dma.hbm_to_vmem [thread:$0]  %s15_s11, 256, %s17_s13, [#allocation3], %s224_s17, %s224_s17, %s225_s18  }
   0x6   :  { %s226_s19 = smov [#allocation5]  }
   0x7   :  { %s29_s20 = sshll.u32 %s226_s19, 4  ;;  %s30_s20 = int_to_ptr.vmem [resolvable:$true] %s29_s20 }
   0x8   :  { %35 = dma.hbm_to_vmem [thread:$0]  %s28_s16, 64, %s30_s20, [#allocation6], %s224_s17, %s224_s17, %s225_s18  }
   0x9   :  { %217 = dma.done.wait [#allocation3], 256  }
   0xa   :  { %218 = vsyncadd [#allocation3], 4294967040 }
   0xb   :  { %219 = dma.done.wait [#allocation6], 64  }
   0xc   :  { %220 = vsyncadd [#allocation6], 4294967232  ;;  %v46_v0 = vld [vmem:[#allocation2] sm:$0x3]  ;;  %v44_v1 = vld [vmem:[#allocation5] sm:$0x3] }
   0xd   :  { %v47_v2 = vld [vmem:[#allocation2 + $0x8] sm:$0x3]  ;;  %v49_v3 = vld [vmem:[#allocation2 + $0x2] sm:$0x3]  ;;  %v50_v4 = vld [vmem:[#allocation2 + $0xa] sm:$0x3] }
   0xe   :  { %v45_v5 = vld [vmem:[#allocation5 + $0x2] sm:$0x3]  ;;  %vm51_vm0 = vcmp.gt.f32.partialorder %v49_v3, %v46_v0  ;;  %vm52_vm1 = vcmp.gt.f32.partialorder %v50_v4, %v47_v2  ;;  %v58_v6 = vld [vmem:[#allocation2 + $0x4] sm:$0x3]  ;;  %v59_v7 = vld [vmem:[#allocation2 + $0xc] sm:$0x3] }
   0xf   :  { %v53_v8 = vsel %vm51_vm0, %v49_v3, %v46_v0  ;;  %v54_v9 = vsel %vm52_vm1, %v50_v4, %v47_v2  ;;  %v227_v10 = vmov 0.0   ;;  %v67_v13 = vld [vmem:[#allocation2 + $0x6] sm:$0x3]  ;;  %v68_v14 = vld [vmem:[#allocation2 + $0xe] sm:$0x3]  ;;  %v85_v19 = vsub.f32 1.0, %v44_v1 }
  0x10   :  { %v55_v11 = vsel %vm51_vm0, 1.0, %v227_v10  ;;  %v56_v12 = vsel %vm52_vm1, 1.0, %v227_v10  ;;  %vm60_vm2 = vcmp.gt.f32.partialorder %v58_v6, %v53_v8  ;;  %vm61_vm3 = vcmp.gt.f32.partialorder %v59_v7, %v54_v9  ;;  %s229_s0 = smov [#allocation7]   ;;  %s123_s23 = sshll.u32 %s256_s2, 4  ;;  %s124_s23 = int_to_ptr.hbm [resolvable:$true] %s123_s23 }
  0x11   :  { %v62_v15 = vsel %vm60_vm2, %v58_v6, %v53_v8  ;;  %v63_v16 = vsel %vm61_vm3, %v59_v7, %v54_v9  ;;  %v64_v17 = vsel %vm60_vm2, 2.0, %v55_v11  ;;  %v65_v18 = vsel %vm61_vm3, 2.0, %v56_v12  ;;  %s121_s1 = sshll.u32 %s229_s0, 4  ;;  %s122_s1 = int_to_ptr.vmem [resolvable:$true] %s121_s1 }
  0x12   :  { %vm69_vm4 = vcmp.gt.f32.partialorder %v67_v13, %v62_v15  ;;  %vm70_vm5 = vcmp.gt.f32.partialorder %v68_v14, %v63_v16  ;;  %v86_v20 = vsub.f32 1.0, %v45_v5  ;;  %v228_v23 = vmov 0.6931472  }
  0x13   :  { %v71_v21 = vsel %vm69_vm4, 3.0, %v64_v17  ;;  %v72_v22 = vsel %vm70_vm5, 3.0, %v65_v18  ;;  %vm105_vm12 = vcmask 1041408  }
  0x14   :  { %vm73_vm6 = vcmp.eq.f32.partialorder %v71_v21, 1.0  ;;  %vm74_vm7 = vcmp.eq.f32.partialorder %v72_v22, 1.0  ;;  %vm77_vm8 = vcmp.eq.f32.partialorder %v71_v21, 2.0  ;;  %vm78_vm9 = vcmp.eq.f32.partialorder %v72_v22, 2.0 }
  0x15   :  { %v75_v24 = vsel %vm73_vm6, 0.3132617, %v228_v23  ;;  %v76_v25 = vsel %vm74_vm7, 0.3132617, %v228_v23  ;;  %vm81_vm10 = vcmp.eq.f32.partialorder %v71_v21, 3.0  ;;  %vm82_vm11 = vcmp.eq.f32.partialorder %v72_v22, 3.0 }
  0x16   :  { %v79_v26 = vsel %vm77_vm8, 0.12692802, %v75_v24  ;;  %v80_v27 = vsel %vm78_vm9, 0.12692802, %v76_v25  ;;  %v87_v28 = vmul.f32 %v85_v19, %v71_v21  ;;  %v88_v29 = vmul.f32 %v86_v20, %v72_v22 }
  0x17   :  { %v83_v30 = vsel %vm81_vm10, 0.048587352, %v79_v26  ;;  %v84_v31 = vsel %vm82_vm11, 0.048587352, %v80_v27 }
  0x18   :  { %v89_v32 = vadd.f32 %v87_v28, %v83_v30  ;;  %v90_v33 = vadd.f32 %v88_v29, %v84_v31 }
  0x1a   :  { %v91_v34 = vsub.f32 0.0, %v89_v32  ;;  %v92_v35 = vsub.f32 0.0, %v90_v33 }
  0x1c   :  { %v93_v36 = vmul.f32 1.442695, %v91_v34  ;;  %v95_v37 = vmul.f32 1.442695, %v92_v35 }
  0x1e   :  { %141 = vpow2.f32 %v93_v36 }
  0x1f   :  { %143 = vpow2.f32 %v95_v37 }
  0x24   :  { %v142_v38 = vpop.eup %141 }
  0x25   :  { %v144_v39 = vpop.eup %143  ;;  %v97_v40 = vsub.f32 1.0, %v142_v38 }
  0x26   :  { %v98_v41 = vsub.f32 1.0, %v144_v39 }
  0x27   :  { %v99_v42 = vmul.f32 %v97_v40, %v97_v40 }
  0x28   :  { %v100_v43 = vmul.f32 %v98_v41, %v98_v41 }
  0x29   :  { %v101_v44 = vmul.f32 0.25, %v99_v42 }
  0x2a   :  { %v102_v45 = vmul.f32 0.25, %v100_v43 }
  0x2b   :  { %v103_v46 = vmul.f32 %v101_v44, %v89_v32 }
  0x2c   :  { %v104_v47 = vmul.f32 %v102_v45, %v90_v33 }
  0x2d   :  { %v106_v48 = vsel %vm105_vm12, %v103_v46, 0.0 }
  0x2e   :  { %v107_v49 = vsel %vm105_vm12, %v104_v47, 0.0 }
  0x2f   :  { %v108_v50 = vadd.f32 %v107_v49, %v106_v48 }
  0x31   :  { %v109_v51 = vrot.slane %v108_v50, 4 }
  0x33   :  { %v110_v52 = vadd.f32 %v109_v51, %v108_v50 }
  0x35   :  { %v111_v53 = vrot.slane %v110_v52, 2 }
  0x37   :  { %v112_v54 = vadd.f32 %v111_v53, %v110_v52 }
  0x39   :  { %v113_v55 = vrot.slane %v112_v54, 1 }
  0x3b   :  { %v114_v56 = vadd.f32 %v113_v55, %v112_v54 }
  0x3d   :  { %115 = vst [vmem:[#allocation7] sm:$0x1] %v114_v56 }
  0x3e   :  { %126 = dma.vmem_to_hbm [thread:$0]  %s122_s1, 16, %s124_s23, [#allocation4]  }
  0x3f   :  { %221 = dma.done.wait [#allocation4], 16  }
  0x40   :  { %222 = vsyncadd [#allocation4], 4294967280 }
  0x41   :  { %131 = vsyncpa [#allocation3], 1 }
  0x42   :  { %132 = vsyncpa [#allocation6], 1 }
  0x43   :  { %133 = vsyncpa [#allocation4], 1 }

</bundles_post_ra>
